<compile_context>
chip_gen: v6e
topology: v6e:2x2x1
jax: 0.10.0
libtpu: 0.0.40
codegen_flags: <defaults>
</compile_context>

<pallas_src>
import functools

import jax
import jax.numpy as jnp
from jax.experimental import pallas as pl
from jax.experimental.pallas import tpu as pltpu

# Globals that are undefined module-level constants in the original script;
# fixed deterministically here (synthetic setup, no checkpoint / data files).
MASKED_PERCENT_PER_UPDATE = 20.0


# ----------------------------------------------------------------------------
# Pallas kernel: per-block lane-partial sums of all loss terms.
#
# Inputs (per grid step):
#   lhs_ref : (40, TB) f32 -- five stacked (8, TB) MXU LHS blocks; per block,
#             one row holds t_decay, one row holds the batch-validity vector.
#   mask_ref: (3, HW) f32  -- temporal / spatial / PC anchor masks.
#   x/p/in/on_ref: (TB, HW) images (native dtype), w_ref: (TB, HW) int8 mask.
# Output:
#   out_ref : (1, 8, HW) f32 -- rows are per-lane partial sums:
#             0: td*temporal  1: td*spatial  2: td*PC  3: td*estimation
#             4: td*|x-p|     5: temporal    6: spatial 7: zeros
# ----------------------------------------------------------------------------
def _pc_loss_kernel(vc, margin, consec_margin, W,
                    lhs_ref, mask_ref,
                    x_ref, p_ref, in_ref, on_ref, w_ref,
                    out_ref):
    f32 = jnp.float32
    p = p_ref[...].astype(f32)           # pred_x_start
    x = x_ref[...].astype(f32)           # x_start
    eps_in = in_ref[...].astype(f32)     # input_noise
    eps_out = on_ref[...].astype(f32)    # output_noise
    wm = w_ref[...].astype(f32)          # weight_matrix (0/1)

    hw = p.shape[1]

    # Neighbour views via XLU rolls on the flattened lane axis
    # (jnp.roll semantics: out[i] = in[i - shift]; wrap-around lanes are
    # killed by the precomputed boundary masks).
    p_up = pltpu.roll(p, W, axis=1)          # p[h-1, w]
    p_dn = pltpu.roll(p, hw - W, axis=1)     # p[h+1, w]
    p_lf = pltpu.roll(p, 1, axis=1)          # p[h, w-1]
    p_rt = pltpu.roll(p, hw - 1, axis=1)     # p[h, w+1]
    p_ur = pltpu.roll(p, W - 1, axis=1)      # p[h-1, w+1]

    m_t = mask_ref[0:1, :]                   # (1, HW), broadcasts over sublanes
    m_s = mask_ref[1:2, :]
    m_pc = mask_ref[2:3, :]

    # Clamp-min at 0.04 matches the reference torch.maximum(consecutive_margin, loss).
    t_loss = m_t * jnp.maximum(consec_margin, (p - p_up) ** 2 + (p - p_dn) ** 2)
    s_loss = m_s * jnp.maximum(consec_margin, (p - p_lf) ** 2 + (p - p_rt) ** 2)

    # Physics-consistency: a = p[h,w], l = p[h-1,w], u = p[h-1,w+1].
    l = p_up
    u = p_ur
    dul = u - l
    ig = (l > vc) == (u > vc)
    il = (l < vc) == (u < vc)
    free_flow = jnp.where(ig, jnp.maximum(margin - dul * (p - l), 0.0), 0.0)
    congested = jnp.where(il, jnp.maximum(margin - dul * (l - p), 0.0), 0.0)
    pc = m_pc * (free_flow + congested)

    est = wm * (eps_out - eps_in) ** 2
    xs = wm * jnp.abs(x - p)

    # Batch reduction + t_decay weighting on the MXU (idle otherwise):
    # each (8, TB) LHS block places its td / validity rows so the dot results
    # land directly in the correct output rows; summing the five (8, HW)
    # results assembles the whole output tile.
    lhs = lhs_ref[...]
    acc = jnp.dot(lhs[0:8, :], t_loss, preferred_element_type=f32)
    acc = acc + jnp.dot(lhs[8:16, :], s_loss, preferred_element_type=f32)
    acc = acc + jnp.dot(lhs[16:24, :], pc, preferred_element_type=f32)
    acc = acc + jnp.dot(lhs[24:32, :], est, preferred_element_type=f32)
    acc = acc + jnp.dot(lhs[32:40, :], xs, preferred_element_type=f32)
    out_ref[0] = acc


# ----------------------------------------------------------------------------
# Generation-aware tiling helpers.
# ----------------------------------------------------------------------------
def _round_up(x, m):
    return ((x + m - 1) // m) * m


def _tpu_device_kind():
    try:
        return jax.devices()[0].device_kind.lower()
    except Exception:
        return ""


def _generation_tuning(device_kind):
    """(tiling VMEM budget, vmem_limit_bytes or None, min grid blocks)."""
    if "v7" in device_kind:
        # 64 MiB physical VMEM, 2 TensorCores: smaller budget, prefer >=2 blocks
        # so the "parallel" batch axis can shard across both cores.
        return 20 * 1024 * 1024, 40 * 1024 * 1024, 2
    if "v6" in device_kind:
        # 128 MiB physical: bigger blocks, raise the scoped limit explicitly.
        return 24 * 1024 * 1024, 64 * 1024 * 1024, 1
    if "v5" in device_kind:
        # v5e is HBM-bound and its scoped default is only 16 MiB: stay small.
        return 8 * 1024 * 1024, None, 1
    return 8 * 1024 * 1024, None, 1


def _choose_batch_tile(batch, hw, budget_bytes, min_blocks):
    """Pick (TB, padded batch).  TB is either the whole (8-aligned) batch or a
    multiple of 128 (keeps the lane-major (40, TB) LHS block DMA-legal when the
    batch is split across several grid steps)."""
    # Per batch row in VMEM: 4 f32 + 1 int8 double-buffered inputs plus ~14
    # live full-width f32 temporaries inside the kernel body.
    per_row_bytes = (4 * 4 + 1) * 2 * hw + 14 * 4 * hw
    max_rows = max(8, budget_bytes // per_row_bytes)
    single = _round_up(batch, 8)
    if single <= max_rows and min_blocks <= 1:
        return single, single
    tb = max(128, (max_rows // 128) * 128)
    if min_blocks > 1:
        per_core = -(-batch // min_blocks)
        tb = min(tb, max(128, _round_up(per_core, 128)))
    if single <= tb:
        return single, single          # batch too small to split usefully
    return tb, _round_up(batch, tb)


# ----------------------------------------------------------------------------
# Wrapper: pallas_call + final scalar arithmetic (plain JAX glue).
# ----------------------------------------------------------------------------
def pc_loss_forward(x_start, pred_x_start, input_noise, output_noise,
                    weight_matrix, t_decay, *,
                    VC=30.0, margin=0.1, beta=10.0, gamma=10.0,
                    train_batch_size=16, current_epoch=0):
    B, C, H, W = x_start.shape
    assert C == 1, "PCLoss operates on single-channel speed matrices"
    HW = H * W
    f32 = jnp.float32

    budget, vmem_limit, min_blocks = _generation_tuning(_tpu_device_kind())
    TB, B_pad = _choose_batch_tile(B, HW, budget, min_blocks)
    num_blocks = B_pad // TB

    # Lane-dense layout: squeeze C, flatten (H, W) -> H*W, zero-pad the batch
    # to B_pad (pad rows contribute nothing: td = valid = weight = 0).
    def prep_img(a, dtype=None):
        a2 = a.reshape(B, HW)
        if dtype is not None:
            a2 = a2.astype(dtype)
        if B_pad != B:
            a2 = jnp.pad(a2, ((0, B_pad - B), (0, 0)))
        return a2

    x_f = prep_img(x_start)
    p_f = prep_img(pred_x_start)
    in_f = prep_img(input_noise)
    on_f = prep_img(output_noise)
    w_i8 = prep_img(weight_matrix, jnp.int8)   # exact 0/1 mask -> int8 (fewer HBM bytes)

    # Five stacked (8, B_pad) MXU LHS blocks (lane-major t_decay / validity).
    td_pad = jnp.zeros((B_pad,), f32).at[:B].set(t_decay.astype(f32).reshape(-1))
    valid = jnp.zeros((B_pad,), f32).at[:B].set(1.0)
    lhs = jnp.zeros((40, B_pad), f32)
    lhs = lhs.at[0].set(td_pad).at[5].set(valid)    # temporal  -> out rows 0, 5
    lhs = lhs.at[9].set(td_pad).at[14].set(valid)   # spatial   -> out rows 1, 6
    lhs = lhs.at[18].set(td_pad)                    # PC        -> out row 2
    lhs = lhs.at[27].set(td_pad)                    # estimation-> out row 3
    lhs = lhs.at[36].set(td_pad)                    # x_start   -> out row 4

    # Boundary masks precomputed once (no int div/mod on the VPU in-kernel).
    lane = jnp.arange(HW, dtype=jnp.int32)
    rr = lane // W
    cc = lane % W
    masks = jnp.stack([
        ((rr >= 1) & (rr <= H - 2)).astype(f32),    # temporal anchors
        ((cc >= 1) & (cc <= W - 2)).astype(f32),    # spatial anchors
        ((rr >= 1) & (cc <= W - 2)).astype(f32),    # PC anchors
    ], axis=0)                                      # (3, HW)

    img_spec = pl.BlockSpec((TB, HW), lambda b: (b, 0))
    kernel = functools.partial(_pc_loss_kernel, float(VC), float(margin),
                               0.04, W)

    cp_kwargs = dict(dimension_semantics=("parallel",))
    if vmem_limit is not None:
        cp_kwargs["vmem_limit_bytes"] = int(vmem_limit)

    partials = pl.pallas_call(
        kernel,
        out_shape=jax.ShapeDtypeStruct((num_blocks, 8, HW), f32),
        grid_spec=pltpu.PrefetchScalarGridSpec(
            num_scalar_prefetch=0,
            grid=(num_blocks,),
            in_specs=[pl.BlockSpec((40, TB), lambda b: (0, b)),
                      pl.BlockSpec((3, HW), lambda b: (0, 0)),
                      img_spec, img_spec, img_spec, img_spec, img_spec],
            out_specs=pl.BlockSpec((1, 8, HW), lambda b: (b, 0, 0))),
        compiler_params=pltpu.CompilerParams(**cp_kwargs),
    )(lhs, masks, x_f, p_f, in_f, on_f, w_i8)

    sums = jnp.sum(partials, axis=(0, 2))          # (8,) final sums

    n_temporal = B * C * (H - 2) * W
    n_spatial = B * C * H * (W - 2)
    n_pc = B * C * (H - 1) * (W - 1)

    temporal_loss = sums[0] / n_temporal
    spatial_loss = sums[1] / n_spatial
    consecutive_loss = spatial_loss + temporal_loss
    pc_loss = sums[2] / n_pc
    # Division by the (global, static) train_batch_size matches the reference.
    estimation_loss = sums[3] / train_batch_size
    x_start_loss = sums[4] / train_batch_size
    origin_temporal_loss = sums[5] / n_temporal
    origin_spatial_loss = sums[6] / n_spatial

    # Epoch-dependent branch of the reference forward (current_epoch is a
    # Python int derived from self.count, so it is a static condition).
    if current_epoch < 1000:
        custom_loss = x_start_loss
    else:
        custom_loss = x_start_loss + beta * pc_loss + gamma * consecutive_loss

    aux = dict(estimation_loss=estimation_loss,
               pc_loss=pc_loss,
               consecutive_loss=consecutive_loss,
               x_start_loss=x_start_loss,
               origin_temporal_loss=origin_temporal_loss,
               origin_spatial_loss=origin_spatial_loss)
    return custom_loss, aux


# ----------------------------------------------------------------------------
# Plain-JAX glue mirroring PCLoss.get_weight_matrix (epoch-0 path of forward).
# TODO(synk): the percentile threshold (sort-based), the host-side numpy
# all_weight_matrix bookkeeping, EMA-model sampling and file I/O have no clean
# Pallas equivalent and stay outside the kernel.
# ----------------------------------------------------------------------------
def get_weight_matrix(speed_matrix, VC, factor, masked_percent_per_update):
    sm = speed_matrix
    t_anc, t_lst, t_nxt = sm[:, :, 1:-1, :], sm[:, :, :-2, :], sm[:, :, 2:, :]
    temporal_loss = (t_anc - t_lst) ** 2 + (t_anc - t_nxt) ** 2
    s_anc, s_lft, s_rgt = sm[:, :, :, 1:-1], sm[:, :, :, :-2], sm[:, :, :, 2:]
    spatial_loss = (s_anc - s_lft) ** 2 + (s_anc - s_rgt) ** 2
    a, l, u = sm[:, :, 1:, :-1], sm[:, :, :-1, :-1], sm[:, :, :-1, 1:]
    ig = jnp.equal(l > VC, u > VC).astype(sm.dtype)
    free_flow = jnp.maximum(-(u - l) * (a - l), 0.0) * ig
    il = jnp.equal(l < VC, u < VC).astype(sm.dtype)
    congested = jnp.maximum(-(u - l) * (l - a), 0.0) * il
    pc = free_flow + congested
    pc_matrix = jnp.full(sm.shape, jnp.mean(pc), sm.dtype)
    pc_matrix = pc_matrix.at[:, :, 1:, :-1].set(pc)
    pc_matrix = 1.0 - pc_matrix / jnp.max(pc_matrix)
    spatial_matrix = jnp.full(sm.shape, jnp.mean(spatial_loss), sm.dtype)
    spatial_matrix = spatial_matrix.at[:, :, :, 1:-1].set(spatial_loss)
    temporal_matrix = jnp.full(sm.shape, jnp.mean(temporal_loss), sm.dtype)
    temporal_matrix = temporal_matrix.at[:, :, 1:-1, :].set(temporal_loss)
    consecutive = spatial_matrix + temporal_matrix
    consecutive = 1.0 - consecutive / jnp.max(consecutive)
    physical = factor * consecutive + (1.0 - factor) * pc_matrix
    thr = jnp.percentile(physical, masked_percent_per_update)
    return jnp.where(physical <= thr, 0.0, 1.0).astype(sm.dtype)


if __name__ == "__main__":
    key = jax.random.PRNGKey(0)
    k1, k2, k3, k4, k5 = jax.random.split(key, 5)

    B, C, H, W = 2, 1, 16, 16          # small "speed matrix" batch
    VC, MARGIN, FACTOR = 30.0, 0.1, 0.5
    BETA, GAMMA = 10.0, 10.0
    TRAIN_BATCH_SIZE = B               # stands in for the global train_batch_size
    COUNT = 0                          # fresh module -> current_epoch = 0

    x_start = jax.random.uniform(k1, (B, C, H, W), jnp.float32, -1.0, 1.0)
    pred_x_start = jax.random.uniform(k2, (B, C, H, W), jnp.float32, -1.0, 1.0)
    input_noise = jax.random.normal(k3, (B, C, H, W), jnp.float32)
    output_noise = jax.random.normal(k4, (B, C, H, W), jnp.float32)
    t_decay = jax.random.uniform(k5, (B,), jnp.float32, 0.5, 1.0)

    # Epoch-0 branch of forward: weight matrix derived from x_start.
    weight_matrix = get_weight_matrix(x_start, VC, FACTOR,
                                      MASKED_PERCENT_PER_UPDATE)

    current_epoch = COUNT // 1  # train_number_per_epoch stand-in -> epoch 0
    custom_loss, aux = pc_loss_forward(
        x_start, pred_x_start, input_noise, output_noise,
        weight_matrix, t_decay,
        VC=VC, margin=MARGIN, beta=BETA, gamma=GAMMA,
        train_batch_size=TRAIN_BATCH_SIZE, current_epoch=current_epoch)

    jax.block_until_ready(custom_loss)
    jax.block_until_ready(aux)
    print("KERNEL_OK")
</pallas_src>

<mosaic_0001>
module attributes {stable_mosaic.version = 11 : i64} {
  func.func @_pc_loss_kernel(%arg0: i32, %arg1: memref<40x8xf32, #tpu.memory_space<vmem>>, %arg2: memref<3x256xf32, #tpu.memory_space<vmem>>, %arg3: memref<8x256xf32, #tpu.memory_space<vmem>>, %arg4: memref<8x256xf32, #tpu.memory_space<vmem>>, %arg5: memref<8x256xf32, #tpu.memory_space<vmem>>, %arg6: memref<8x256xf32, #tpu.memory_space<vmem>>, %arg7: memref<8x256xi8, #tpu.memory_space<vmem>>, %arg8: memref<1x8x256xf32, #tpu.memory_space<vmem>>) attributes {dimension_semantics = [#tpu.dimension_semantics<parallel>], iteration_bounds = array<i64: 1>, scalar_prefetch = 0 : i64, scratch_operands = 0 : i64, tpu.core_type = #tpu.core_type<tc>, window_params = [{transform_indices = @transform_0, window_bounds = array<i64: 40, 8>}, {pipeline_mode = #tpu.pipeline_mode<synchronous>, transform_indices = @transform_1, window_bounds = array<i64: 3, 256>}, {transform_indices = @transform_2, window_bounds = array<i64: 8, 256>}, {transform_indices = @transform_3, window_bounds = array<i64: 8, 256>}, {transform_indices = @transform_4, window_bounds = array<i64: 8, 256>}, {transform_indices = @transform_5, window_bounds = array<i64: 8, 256>}, {transform_indices = @transform_6, window_bounds = array<i64: 8, 256>}, {transform_indices = @transform_7, window_bounds = array<i64: 1, 8, 256>}]} {
    %c0 = arith.constant 0 : index
    %c0_0 = arith.constant 0 : index
    %0 = vector.load %arg4[%c0, %c0_0] : memref<8x256xf32, #tpu.memory_space<vmem>>, vector<8x256xf32>
    %c0_1 = arith.constant 0 : index
    %c0_2 = arith.constant 0 : index
    %1 = vector.load %arg3[%c0_1, %c0_2] : memref<8x256xf32, #tpu.memory_space<vmem>>, vector<8x256xf32>
    %c0_3 = arith.constant 0 : index
    %c0_4 = arith.constant 0 : index
    %2 = vector.load %arg5[%c0_3, %c0_4] : memref<8x256xf32, #tpu.memory_space<vmem>>, vector<8x256xf32>
    %c0_5 = arith.constant 0 : index
    %c0_6 = arith.constant 0 : index
    %3 = vector.load %arg6[%c0_5, %c0_6] : memref<8x256xf32, #tpu.memory_space<vmem>>, vector<8x256xf32>
    %c0_7 = arith.constant 0 : index
    %c0_8 = arith.constant 0 : index
    %4 = vector.load %arg7[%c0_7, %c0_8] : memref<8x256xi8, #tpu.memory_space<vmem>>, vector<8x256xi8>
    %5 = arith.sitofp %4 : vector<8x256xi8> to vector<8x256xf32>
    %c16_i32 = arith.constant 16 : i32
    %6 = tpu.dynamic_rotate %0 by %c16_i32 dim 1 : vector<8x256xf32>, i32 -> vector<8x256xf32>
    %c240_i32 = arith.constant 240 : i32
    %7 = tpu.dynamic_rotate %0 by %c240_i32 dim 1 : vector<8x256xf32>, i32 -> vector<8x256xf32>
    %c1_i32 = arith.constant 1 : i32
    %8 = tpu.dynamic_rotate %0 by %c1_i32 dim 1 : vector<8x256xf32>, i32 -> vector<8x256xf32>
    %c255_i32 = arith.constant 255 : i32
    %9 = tpu.dynamic_rotate %0 by %c255_i32 dim 1 : vector<8x256xf32>, i32 -> vector<8x256xf32>
    %c15_i32 = arith.constant 15 : i32
    %10 = tpu.dynamic_rotate %0 by %c15_i32 dim 1 : vector<8x256xf32>, i32 -> vector<8x256xf32>
    %c0_9 = arith.constant 0 : index
    %c0_10 = arith.constant 0 : index
    %11 = vector.load %arg2[%c0_9, %c0_10] : memref<3x256xf32, #tpu.memory_space<vmem>>, vector<1x256xf32>
    %c1 = arith.constant 1 : index
    %c0_11 = arith.constant 0 : index
    %12 = vector.load %arg2[%c1, %c0_11] : memref<3x256xf32, #tpu.memory_space<vmem>>, vector<1x256xf32>
    %c2 = arith.constant 2 : index
    %c0_12 = arith.constant 0 : index
    %13 = vector.load %arg2[%c2, %c0_12] : memref<3x256xf32, #tpu.memory_space<vmem>>, vector<1x256xf32>
    %14 = arith.subf %0, %6 : vector<8x256xf32>
    %15 = arith.mulf %14, %14 : vector<8x256xf32>
    %16 = arith.subf %0, %7 : vector<8x256xf32>
    %17 = arith.mulf %16, %16 : vector<8x256xf32>
    %18 = arith.addf %15, %17 : vector<8x256xf32>
    %cst = arith.constant 4.000000e-02 : f32
    %19 = vector.broadcast %cst : f32 to vector<8x256xf32>
    %20 = arith.maximumf %19, %18 : vector<8x256xf32>
    %21 = vector.broadcast %11 : vector<1x256xf32> to vector<8x256xf32>
    %22 = arith.mulf %21, %20 : vector<8x256xf32>
    %23 = arith.subf %0, %8 : vector<8x256xf32>
    %24 = arith.mulf %23, %23 : vector<8x256xf32>
    %25 = arith.subf %0, %9 : vector<8x256xf32>
    %26 = arith.mulf %25, %25 : vector<8x256xf32>
    %27 = arith.addf %24, %26 : vector<8x256xf32>
    %cst_13 = arith.constant 4.000000e-02 : f32
    %28 = vector.broadcast %cst_13 : f32 to vector<8x256xf32>
    %29 = arith.maximumf %28, %27 : vector<8x256xf32>
    %30 = vector.broadcast %12 : vector<1x256xf32> to vector<8x256xf32>
    %31 = arith.mulf %30, %29 : vector<8x256xf32>
    %32 = arith.subf %10, %6 : vector<8x256xf32>
    %cst_14 = arith.constant 3.000000e+01 : f32
    %33 = vector.broadcast %cst_14 : f32 to vector<8x256xf32>
    %34 = arith.cmpf ogt, %6, %33 : vector<8x256xf32>
    %cst_15 = arith.constant 3.000000e+01 : f32
    %35 = vector.broadcast %cst_15 : f32 to vector<8x256xf32>
    %36 = arith.cmpf ogt, %10, %35 : vector<8x256xf32>
    %37 = arith.xori %34, %36 : vector<8x256xi1>
    %cst_16 = arith.constant dense<true> : vector<8x256xi1>
    %38 = arith.xori %37, %cst_16 : vector<8x256xi1>
    %cst_17 = arith.constant 3.000000e+01 : f32
    %39 = vector.broadcast %cst_17 : f32 to vector<8x256xf32>
    %40 = arith.cmpf olt, %6, %39 : vector<8x256xf32>
    %cst_18 = arith.constant 3.000000e+01 : f32
    %41 = vector.broadcast %cst_18 : f32 to vector<8x256xf32>
    %42 = arith.cmpf olt, %10, %41 : vector<8x256xf32>
    %43 = arith.xori %40, %42 : vector<8x256xi1>
    %cst_19 = arith.constant dense<true> : vector<8x256xi1>
    %44 = arith.xori %43, %cst_19 : vector<8x256xi1>
    %45 = arith.subf %0, %6 : vector<8x256xf32>
    %46 = arith.mulf %32, %45 : vector<8x256xf32>
    %cst_20 = arith.constant 1.000000e-01 : f32
    %47 = vector.broadcast %cst_20 : f32 to vector<8x256xf32>
    %48 = arith.subf %47, %46 : vector<8x256xf32>
    %cst_21 = arith.constant 0.000000e+00 : f32
    %49 = vector.broadcast %cst_21 : f32 to vector<8x256xf32>
    %50 = arith.maximumf %48, %49 : vector<8x256xf32>
    %cst_22 = arith.constant 0.000000e+00 : f32
    %51 = vector.broadcast %cst_22 : f32 to vector<8x256xf32>
    %52 = arith.select %38, %50, %51 : vector<8x256xi1>, vector<8x256xf32>
    %53 = arith.subf %6, %0 : vector<8x256xf32>
    %54 = arith.mulf %32, %53 : vector<8x256xf32>
    %cst_23 = arith.constant 1.000000e-01 : f32
    %55 = vector.broadcast %cst_23 : f32 to vector<8x256xf32>
    %56 = arith.subf %55, %54 : vector<8x256xf32>
    %cst_24 = arith.constant 0.000000e+00 : f32
    %57 = vector.broadcast %cst_24 : f32 to vector<8x256xf32>
    %58 = arith.maximumf %56, %57 : vector<8x256xf32>
    %cst_25 = arith.constant 0.000000e+00 : f32
    %59 = vector.broadcast %cst_25 : f32 to vector<8x256xf32>
    %60 = arith.select %44, %58, %59 : vector<8x256xi1>, vector<8x256xf32>
    %61 = arith.addf %52, %60 : vector<8x256xf32>
    %62 = vector.broadcast %13 : vector<1x256xf32> to vector<8x256xf32>
    %63 = arith.mulf %62, %61 : vector<8x256xf32>
    %64 = arith.subf %3, %2 : vector<8x256xf32>
    %65 = arith.mulf %64, %64 : vector<8x256xf32>
    %66 = arith.mulf %5, %65 : vector<8x256xf32>
    %67 = arith.subf %1, %0 : vector<8x256xf32>
    %68 = math.absf %67 : vector<8x256xf32>
    %69 = arith.mulf %5, %68 : vector<8x256xf32>
    %c0_26 = arith.constant 0 : index
    %c0_27 = arith.constant 0 : index
    %70 = vector.load %arg1[%c0_26, %c0_27] : memref<40x8xf32, #tpu.memory_space<vmem>>, vector<40x8xf32>
    %71 = vector.extract_strided_slice %70 {offsets = [0, 0], sizes = [8, 8], strides = [1, 1]} : vector<40x8xf32> to vector<8x8xf32>
    %cst_28 = arith.constant dense<0.000000e+00> : vector<8x256xf32>
    %72 = tpu.matmul %71, %22, %cst_28 {dimension_numbers = #tpu.dot_dimension_numbers<[1], [0], [0], [1], [0, 0, 1, 1], [], []>} : vector<8x8xf32>, vector<8x256xf32>, vector<8x256xf32> -> vector<8x256xf32>
    %73 = vector.extract_strided_slice %70 {offsets = [8, 0], sizes = [8, 8], strides = [1, 1]} : vector<40x8xf32> to vector<8x8xf32>
    %cst_29 = arith.constant dense<0.000000e+00> : vector<8x256xf32>
    %74 = tpu.matmul %73, %31, %cst_29 {dimension_numbers = #tpu.dot_dimension_numbers<[1], [0], [0], [1], [0, 0, 1, 1], [], []>} : vector<8x8xf32>, vector<8x256xf32>, vector<8x256xf32> -> vector<8x256xf32>
    %75 = arith.addf %72, %74 : vector<8x256xf32>
    %76 = vector.extract_strided_slice %70 {offsets = [16, 0], sizes = [8, 8], strides = [1, 1]} : vector<40x8xf32> to vector<8x8xf32>
    %cst_30 = arith.constant dense<0.000000e+00> : vector<8x256xf32>
    %77 = tpu.matmul %76, %63, %cst_30 {dimension_numbers = #tpu.dot_dimension_numbers<[1], [0], [0], [1], [0, 0, 1, 1], [], []>} : vector<8x8xf32>, vector<8x256xf32>, vector<8x256xf32> -> vector<8x256xf32>
    %78 = arith.addf %75, %77 : vector<8x256xf32>
    %79 = vector.extract_strided_slice %70 {offsets = [24, 0], sizes = [8, 8], strides = [1, 1]} : vector<40x8xf32> to vector<8x8xf32>
    %cst_31 = arith.constant dense<0.000000e+00> : vector<8x256xf32>
    %80 = tpu.matmul %79, %66, %cst_31 {dimension_numbers = #tpu.dot_dimension_numbers<[1], [0], [0], [1], [0, 0, 1, 1], [], []>} : vector<8x8xf32>, vector<8x256xf32>, vector<8x256xf32> -> vector<8x256xf32>
    %81 = arith.addf %78, %80 : vector<8x256xf32>
    %82 = vector.extract_strided_slice %70 {offsets = [32, 0], sizes = [8, 8], strides = [1, 1]} : vector<40x8xf32> to vector<8x8xf32>
    %cst_32 = arith.constant dense<0.000000e+00> : vector<8x256xf32>
    %83 = tpu.matmul %82, %69, %cst_32 {dimension_numbers = #tpu.dot_dimension_numbers<[1], [0], [0], [1], [0, 0, 1, 1], [], []>} : vector<8x8xf32>, vector<8x256xf32>, vector<8x256xf32> -> vector<8x256xf32>
    %84 = arith.addf %81, %83 : vector<8x256xf32>
    %c0_33 = arith.constant 0 : index
    %c0_34 = arith.constant 0 : index
    %c0_35 = arith.constant 0 : index
    %85 = vector.load %arg8[%c0_33, %c0_34, %c0_35] : memref<1x8x256xf32, #tpu.memory_space<vmem>>, vector<1x8x256xf32>
    %86 = vector.shape_cast %85 : vector<1x8x256xf32> to vector<8x256xf32>
    %87 = vector.shape_cast %84 : vector<8x256xf32> to vector<1x8x256xf32>
    tpu.vector_store %arg8[%c0_33, %c0_34, %c0_35], %87 {strides = array<i32>} : memref<1x8x256xf32, #tpu.memory_space<vmem>>, vector<1x8x256xf32>,
    return
  }
  func.func @transform_0(%arg0: i32) -> (i32, i32) {
    %c0_i32 = arith.constant 0 : i32
    %c0_i32_0 = arith.constant 0 : i32
    return %c0_i32, %arg0 : i32, i32
  }
  func.func @transform_1(%arg0: i32) -> (i32, i32) {
    %c0_i32 = arith.constant 0 : i32
    %c0_i32_0 = arith.constant 0 : i32
    %c0_i32_1 = arith.constant 0 : i32
    return %c0_i32, %c0_i32_0 : i32, i32
  }
  func.func @transform_2(%arg0: i32) -> (i32, i32) {
    %c0_i32 = arith.constant 0 : i32
    %c0_i32_0 = arith.constant 0 : i32
    return %arg0, %c0_i32 : i32, i32
  }
  func.func @transform_3(%arg0: i32) -> (i32, i32) {
    %c0_i32 = arith.constant 0 : i32
    %c0_i32_0 = arith.constant 0 : i32
    return %arg0, %c0_i32 : i32, i32
  }
  func.func @transform_4(%arg0: i32) -> (i32, i32) {
    %c0_i32 = arith.constant 0 : i32
    %c0_i32_0 = arith.constant 0 : i32
    return %arg0, %c0_i32 : i32, i32
  }
  func.func @transform_5(%arg0: i32) -> (i32, i32) {
    %c0_i32 = arith.constant 0 : i32
    %c0_i32_0 = arith.constant 0 : i32
    return %arg0, %c0_i32 : i32, i32
  }
  func.func @transform_6(%arg0: i32) -> (i32, i32) {
    %c0_i32 = arith.constant 0 : i32
    %c0_i32_0 = arith.constant 0 : i32
    return %arg0, %c0_i32 : i32, i32
  }
  func.func @transform_7(%arg0: i32) -> (i32, i32, i32) {
    %c0_i32 = arith.constant 0 : i32
    %c0_i32_0 = arith.constant 0 : i32
    %c0_i32_1 = arith.constant 0 : i32
    return %arg0, %c0_i32, %c0_i32_0 : i32, i32, i32
  }
}

</mosaic_0001>

<bundles_post_ra>
// kernel: tpu_custom_call.1
= control target key start
LH: loop header
LB: loop body
LE: loop exit
PB: predicated region body
PF: predicated region fallthrough
CT: control target
= control target key end

     0   :  { %12 = vsyncpa [#allocation3], 0  ;;  %s936_s0 = inlined_call_operand.vmem [shape: f32[40,8], index: 0, kind: input, shape index: {}]   ;;  %s937_s1 = inlined_call_operand.hbm [shape: f32[3,256], index: 1, kind: input, shape index: {}]   ;;  %s938_s2 = inlined_call_operand.vmem [shape: f32[8,256], index: 2, kind: input, shape index: {}]   ;;  %s939_s3 = inlined_call_operand.vmem [shape: f32[8,256], index: 3, kind: input, shape index: {}]   ;;  %s940_s4 = inlined_call_operand.vmem [shape: f32[8,256], index: 4, kind: input, shape index: {}]   ;;  %s941_s5 = inlined_call_operand.hbm [shape: f32[8,256], index: 5, kind: input, shape index: {}]   ;;  %s942_s6 = inlined_call_operand.vmem [shape: s8[8,256], index: 6, kind: input, shape index: {}]   ;;  %s943_s7 = inlined_call_operand.hbm [shape: f32[1,8,256], index: 7, kind: output, shape index: {}]  }
   0x1   :  { %13 = vsyncpa [#allocation6], 0 }
   0x2   :  { %14 = vsyncpa [#allocation4], 0  ;;  %s700_s24 = smov [#allocation2]   ;;  %s701_s26 = smov [#allocation5]  }
   0x3   :  { %s23_s25 = sshll.u32 %s700_s24, 4  ;;  %s39_s27 = sshll.u32 %s701_s26, 4  ;;  %s24_s25 = int_to_ptr.vmem [resolvable:$true] %s23_s25  ;;  %s40_s27 = int_to_ptr.vmem [resolvable:$true] %s39_s27 }
   0x4   :  { %s642_s28 = scalar_lea.vmem %s24_s25, 128  ;;  %p647_p1 = scmp.lt.s32.totalorder %s24_s25, %s24_s25 }
   0x5   :  { %p643_p0 = scmp.ne.s32.totalorder %s24_s25, %s642_s28  ;;  %p648_p2 = scmp.lt.s32.totalorder %s642_s28, %s642_s28 }
   0x7   :  { %p649_p3 = por %p648_p2, %p647_p1 }
   0x9   :  { %p650_p4 = pnand %p649_p3, %p643_p0 }
   0xb   :  { %653 = shalt.err (!%p650_p4)
}
   0xc   :  { %26 = dma.hbm_to_vmem [thread:$0]  %s937_s1, 128, %s24_s25, [#allocation3]  }
   0xd   :  { %s662_s8 = scalar_lea.vmem %s40_s27, 256  ;;  %p667_p6 = scmp.lt.s32.totalorder %s40_s27, %s40_s27 }
   0xe   :  { %p663_p5 = scmp.ne.s32.totalorder %s40_s27, %s662_s8  ;;  %p668_p7 = scmp.lt.s32.totalorder %s662_s8, %s662_s8 }
  0x10   :  { %p669_p8 = por %p668_p7, %p667_p6 }
  0x12   :  { %p670_p9 = pnand %p669_p8, %p663_p5 }
  0x14   :  { %673 = shalt.err (!%p670_p9)
}
  0x15   :  { %42 = dma.hbm_to_vmem [thread:$0]  %s941_s5, 256, %s40_s27, [#allocation6]  }
  0x16   :  { %694 = dma.done.wait [#allocation3], 128  }
  0x17   :  { %695 = vsyncadd [#allocation3], 4294967168 }
  0x18   :  { %696 = dma.done.wait [#allocation6], 256  }
  0x19   :  { %697 = vsyncadd [#allocation6], 4294967040  ;;  %v759_v0 = vld [vmem:[%s939_s3] sm:$0xff]  ;;  %s702_s1 = smov 127   ;;  %s703_s13 = smov 1   ;;  %v766_v1 = vld [vmem:[%s939_s3 + $0x8] sm:$0xff]  ;;  %v68_v3 = vlaneseq }
  0x1a   :  { %87 = vrot.lane.b32.xlu1 %v759_v0, %s702_s1  ;;  %80 = vrot.lane.b32.xlu0 %v759_v0, %s703_s13  ;;  %s704_s5 = smov 16   ;;  %v705_v2 = vmov 0.0   ;;  %s706_s16 = smov 15   ;;  %v782_v9 = vld [vmem:[#allocation2 + $0x1] ss:$4 sm:$0x3] }
  0x1b   :  { %292 = vmatprep.mubr.f32.mxu0 %v705_v2  ;;  %366 = vmatprep.mubr.f32.mxu1 %v705_v2  ;;  %s707_s3 = smov 112   ;;  %v120_v4 = vshrl.u32 %v68_v3, 7  ;;  %v778_v5 = vand.u32 127, %v68_v3  ;;  %v59_v10 = vld [vmem:[%s942_s6] sm:$0xf]  ;;  %v56_v27 = vld [vmem:[%s940_s4 + $0x8] sm:$0xff] }
  0x1c   :  { %v795_v15 = vld [vmem:[#allocation2 + $0x2] ss:$4 sm:$0x3]  ;;  %v60_v16 = vunpack.c.0.s8 %v59_v10  ;;  %v61_v17 = vunpack.c.1.s8 %v59_v10  ;;  %v801_v26 = vld [vmem:[#allocation2] ss:$4 sm:$0x3] }
  0x1d   :  { %v780_v8 = vsub.s32 1, %v120_v4  ;;  %vm91_vm0 = vcmp.lt.s32.totalorder %v778_v5, 127  ;;  %vm84_vm1 = vcmp.lt.s32.totalorder %v778_v5, 1  ;;  %vm70_vm2 = vcmp.lt.s32.totalorder %v778_v5, 16  ;;  %v58_v31 = vld [vmem:[#allocation5 + $0x8] sm:$0xff]  ;;  %v55_v32 = vld [vmem:[%s940_s4] sm:$0xff] }
  0x1e   :  { %89 = vrot.lane.b32.xlu1 %v766_v1, %s702_s1  ;;  %82 = vrot.lane.b32.xlu0 %v766_v1, %s703_s13  ;;  %v790_v11 = vsub.s32 0, %v120_v4  ;;  %vm98_vm3 = vcmp.lt.s32.totalorder %v778_v5, 15  ;;  %vm77_vm4 = vcmp.lt.s32.totalorder %v778_v5, 112  ;;  %v57_v33 = vld [vmem:[#allocation5] sm:$0xff]  ;;  %vm224_vm5 = vcmask 64512  }
  0x1f   :  { %v151_v14 = vrot.slane %v782_v9, %v780_v8  ;;  %v202_v30 = vrot.slane %v795_v15, %v780_v8  ;;  %v819_v40 = vld [vmem:[%s938_s2 + $0x8] sm:$0xff]  ;;  %v126_v43 = vrot.slane %v801_v26, %v780_v8  ;;  %v829_v45 = vcvt.s32.f32 %v60_v16 }
  0x20   :  { %v147_v28 = vrot.slane %v782_v9, %v790_v11  ;;  %v198_v29 = vrot.slane %v795_v15, %v790_v11  ;;  %v122_v44 = vrot.slane %v801_v26, %v790_v11  ;;  %v831_v46 = vcvt.s32.f32 %v61_v17  ;;  %v219_v15 = vld [vmem:[%s936_s0] sm:$0xff]  ;;  %v222_v26 = vld [vmem:[%s936_s0 + $0x18] sm:$0xff] }
  0x21   :  { %v833_v47 = vsub.f32 %v58_v31, %v56_v27  ;;  %v835_v48 = vsub.f32 %v57_v33, %v55_v32  ;;  %v214_v51 = vsub.f32 %v819_v40, %v766_v1  ;;  %vm708_vm15 = vmmov 1   ;;  %v221_v40 = vld [vmem:[%s936_s0 + $0x10] sm:$0xff] }
  0x22   :  { %66 = vrot.lane.b32.xlu1 %v766_v1, %s704_s5  ;;  %64 = vrot.lane.b32.xlu0 %v759_v0, %s704_s5 }
  0x26   :  { %96 = vrot.lane.b32.xlu1 %v766_v1, %s706_s16  ;;  %94 = vrot.lane.b32.xlu0 %v759_v0, %s706_s16 }
  0x2a   :  { %75 = vrot.lane.b32.xlu1 %v766_v1, %s707_s3  ;;  %73 = vrot.lane.b32.xlu0 %v759_v0, %s707_s3 }
  0x8c   :  { %v88_v6 = vpop.permute.xlu1 %87  ;;  %v81_v7 = vpop.permute.xlu0 %80 }
  0x90   :  { %v90_v12 = vpop.permute.xlu1 %89  ;;  %v83_v13 = vpop.permute.xlu0 %82 }
  0x91   :  { %v92_v18 = vsel %vm91_vm0, %v88_v6, %v90_v12  ;;  %v93_v19 = vsel %vm91_vm0, %v90_v12, %v88_v6  ;;  %v85_v20 = vsel %vm84_vm1, %v81_v7, %v83_v13  ;;  %v86_v21 = vsel %vm84_vm1, %v83_v13, %v81_v7 }
  0x92   :  { %v135_v22 = vsub.f32 %v759_v0, %v92_v18  ;;  %v136_v23 = vsub.f32 %v766_v1, %v93_v19  ;;  %v131_v24 = vsub.f32 %v759_v0, %v86_v21  ;;  %v132_v25 = vsub.f32 %v766_v1, %v85_v20  ;;  %v220_v21 = vld [vmem:[%s936_s0 + $0x8] sm:$0xff] }
  0x94   :  { %v137_v34 = vmul.f32 %v135_v22, %v135_v22  ;;  %v138_v35 = vmul.f32 %v136_v23, %v136_v23  ;;  %v133_v36 = vmul.f32 %v131_v24, %v131_v24  ;;  %v134_v37 = vmul.f32 %v132_v25, %v132_v25  ;;  %v67_v38 = vpop.permute.xlu1 %66  ;;  %v65_v39 = vpop.permute.xlu0 %64  ;;  %v53_v22 = vld [vmem:[%s938_s2] sm:$0xff] }
  0x95   :  { %v71_v41 = vsel %vm70_vm2, %v65_v39, %v67_v38  ;;  %v72_v42 = vsel %vm70_vm2, %v67_v38, %v65_v39  ;;  %v213_v38 = vsub.f32 %v53_v22, %v759_v0 }
  0x96   :  { %v106_v49 = vsub.f32 %v759_v0, %v72_v42  ;;  %v107_v50 = vsub.f32 %v766_v1, %v71_v41  ;;  %vm158_vm6 = vcmp.gt.f32.partialorder %v72_v42, 30.0  ;;  %vm159_vm7 = vcmp.gt.f32.partialorder %v71_v41, 30.0 }
  0x97   :  { %vm166_vm8 = vcmp.lt.f32.partialorder %v72_v42, 30.0  ;;  %v140_v54 = vadd.f32 %v138_v35, %v134_v37  ;;  %v139_v55 = vadd.f32 %v137_v34, %v133_v36  ;;  %v182_v56 = vsub.f32 %v72_v42, %v759_v0 }
  0x98   :  { %v97_v52 = vpop.permute.xlu1 %96  ;;  %v95_v53 = vpop.permute.xlu0 %94  ;;  %v183_v57 = vsub.f32 %v71_v41, %v766_v1  ;;  %vm167_vm2 = vcmp.lt.f32.partialorder %v71_v41, 30.0  ;;  %v109_v37 = vmul.f32 %v107_v50, %v107_v50 }
  0x99   :  { %v99_v58 = vsel %vm98_vm3, %v95_v53, %v97_v52  ;;  %v100_v59 = vsel %vm98_vm3, %v97_v52, %v95_v53  ;;  %v142_v62 = vmax.f32 %v140_v54, 0.04  ;;  %v141_v63 = vmax.f32 %v139_v55, 0.04 }
  0x9a   :  { %v156_v60 = vsub.f32 %v100_v59, %v72_v42  ;;  %v157_v61 = vsub.f32 %v99_v58, %v71_v41  ;;  %vm160_vm9 = vcmp.gt.f32.partialorder %v100_v59, 30.0  ;;  %vm161_vm10 = vcmp.gt.f32.partialorder %v99_v58, 30.0 }
  0x9b   :  { %vm162_vm11 = vmxor %vm158_vm6, %vm160_vm9  ;;  %vm168_vm12 = vcmp.lt.f32.partialorder %v100_v59, 30.0  ;;  %vm169_vm13 = vcmp.lt.f32.partialorder %v99_v58, 30.0  ;;  %v155_v17 = vmul.f32 %v151_v14, %v142_v62  ;;  %v154_v20 = vmul.f32 %v147_v28, %v141_v63 }
  0x9c   :  { %vm849_vm14 = vmxor %vm159_vm7, %vm161_vm10  ;;  %v174_v4 = vmul.f32 %v156_v60, %v106_v49  ;;  %v175_v6 = vmul.f32 %v157_v61, %v107_v50  ;;  %v184_v7 = vmul.f32 %v182_v56, %v156_v60  ;;  %v185_v10 = vmul.f32 %v183_v57, %v157_v61  ;;  %v76_v12 = vpop.permute.xlu1 %75  ;;  %v74_v13 = vpop.permute.xlu0 %73 }
  0x9d   :  { %vm854_vm0 = vmxor %vm162_vm11, %vm708_vm15  ;;  %v78_v18 = vsel %vm77_vm4, %v74_v13, %v76_v12  ;;  %v79_v19 = vsel %vm77_vm4, %v76_v12, %v74_v13  ;;  %258 = vmatprep.subr.mxu0 %v155_v17  ;;  %v108_v28 = vmul.f32 %v106_v49, %v106_v49  ;;  %v210_v50 = vmul.f32 %v833_v47, %v833_v47 }
  0x9e   :  { %vm874_vm1 = vmxor %vm849_vm14, %vm708_vm15  ;;  %v176_v14 = vsub.f32 0.1, %v174_v4  ;;  %v177_v23 = vsub.f32 0.1, %v175_v6  ;;  %v186_v5 = vsub.f32 0.1, %v184_v7  ;;  %v110_v24 = vsub.f32 %v759_v0, %v78_v18  ;;  %259 = vmatpush1.msra.mxu0 %v154_v20 }
  0x9f   :  { %vm170_vm3 = vmxor %vm166_vm8, %vm168_vm12  ;;  %v187_v25 = vsub.f32 0.1, %v185_v10  ;;  %v111_v27 = vsub.f32 %v766_v1, %v79_v19  ;;  %619 = vmatmul.mubr.msk.f32.vlgmr.msra.gmra.mxu0 %vm224_vm5, %v220_v21  ;;  %v209_v56 = vmul.f32 %v835_v48, %v835_v48  ;;  %v216_v57 = vand.u32 2147483647, %v214_v51 }
  0xa0   :  { %vm171_vm4 = vmxor %vm167_vm2, %vm169_vm13  ;;  %v178_v31 = vmax.f32 %v176_v14, 0.0  ;;  %v179_v32 = vmax.f32 %v177_v23, 0.0  ;;  %v188_v33 = vmax.f32 %v186_v5, 0.0  ;;  %v112_v34 = vmul.f32 %v110_v24, %v110_v24  ;;  %440 = vmatprep.mubr.f32.mxu0 %v705_v2 }
  0xa1   :  { %vm172_vm6 = vmxor %vm170_vm3, %vm708_vm15  ;;  %v189_v35 = vmax.f32 %v187_v25, 0.0  ;;  %v113_v36 = vmul.f32 %v111_v27, %v111_v27  ;;  %v215_v60 = vand.u32 2147483647, %v213_v38  ;;  %v212_v1 = vmul.f32 %v210_v50, %v831_v46 }
  0xa2   :  { %vm173_vm7 = vmxor %vm171_vm4, %vm708_vm15  ;;  %v180_v39 = vsel %vm854_vm0, %v178_v31, 0.0  ;;  %v190_v41 = vsel %vm172_vm6, %v188_v33, 0.0  ;;  %v181_v42 = vsel %vm874_vm1, %v179_v32, 0.0  ;;  %v114_v49 = vadd.f32 %v112_v34, %v108_v28 }
  0xa3   :  { %v192_v52 = vadd.f32 %v190_v41, %v180_v39  ;;  %v191_v53 = vsel %vm173_vm7, %v189_v35, 0.0  ;;  %v115_v54 = vadd.f32 %v113_v36, %v109_v37  ;;  %v218_v11 = vmul.f32 %v216_v57, %v831_v46 }
  0xa4   :  { %v193_v55 = vadd.f32 %v191_v53, %v181_v42  ;;  %v116_v0 = vmax.f32 %v114_v49, 0.04  ;;  %v217_v8 = vmul.f32 %v215_v60, %v829_v45 }
  0xa5   :  { %v117_v58 = vmax.f32 %v115_v54, 0.04  ;;  %v205_v59 = vmul.f32 %v198_v29, %v192_v52  ;;  %v211_v29 = vmul.f32 %v209_v56, %v829_v45 }
  0xa6   :  { %v206_v61 = vmul.f32 %v202_v30, %v193_v55  ;;  %v129_v47 = vmul.f32 %v122_v44, %v116_v0  ;;  %v223_v30 = vld [vmem:[%s936_s0 + $0x20] sm:$0xff]  ;;  %s709_s0 = smov [#allocation7]  }
  0xa7   :  { %v130_v48 = vmul.f32 %v126_v43, %v117_v58  ;;  %s609_s11 = sshll.u32 %s709_s0, 4  ;;  %s610_s11 = int_to_ptr.vmem [resolvable:$true] %s609_s11 }
  0xa8   :  { %406 = vmatprep.subr.mxu0 %v206_v61  ;;  %s674_s12 = scalar_lea.vmem %s610_s11, 256  ;;  %p679_p11 = scmp.lt.s32.totalorder %s610_s11, %s610_s11 }
  0xa9   :  { %332 = vmatprep.subr.mxu1 %v130_v48  ;;  %407 = vmatpush1.msra.mxu0 %v205_v59  ;;  %p675_p10 = scmp.ne.s32.totalorder %s610_s11, %s674_s12  ;;  %p680_p12 = scmp.lt.s32.totalorder %s674_s12, %s674_s12 }
  0xaa   :  { %333 = vmatpush1.msra.mxu1 %v129_v47  ;;  %621 = vmatmul.mubr.msk.f32.vlgmr.msra.gmra.mxu0 %vm224_vm5, %v221_v40 }
  0xab   :  { %620 = vmatmul.mubr.msk.f32.vlgmr.msra.gmra.mxu1 %vm224_vm5, %v219_v15  ;;  %482 = vmatprep.subr.mxu1 %v212_v1  ;;  %p681_p13 = por %p680_p12, %p679_p11 }
  0xac   :  { %483 = vmatpush1.msra.mxu1 %v211_v29  ;;  %558 = vmatprep.subr.mxu0 %v218_v11 }
  0xad   :  { %516 = vmatprep.mubr.f32.mxu1 %v705_v2  ;;  %559 = vmatpush1.msra.mxu0 %v217_v8  ;;  %p682_p0 = pnand %p681_p13, %p675_p10 }
  0xae   :  { %592 = vmatprep.mubr.f32.mxu0 %v705_v2 }
  0xaf   :  { %622 = vmatmul.mubr.msk.f32.vlgmr.msra.gmra.mxu1 %vm224_vm5, %v222_v26  ;;  %623 = vmatmul.mubr.msk.f32.vlgmr.msra.gmra.mxu0 %vm224_vm5, %v223_v30 }
 0x15f   :  { %v294_v43 = vpop.f32.mrf.mxu0 }
 0x161   :  { %v296_v44 = vpop.f32.mrf.mxu0 }
 0x16a   :  { %v442_v45 = vpop.f32.mrf.mxu0 }
 0x16b   :  { %v368_v46 = vpop.f32.mrf.mxu1 }
 0x16c   :  { %v369_v51 = vadd.f32 %v368_v46, %v294_v43  ;;  %v444_v62 = vpop.f32.mrf.mxu0 }
 0x16d   :  { %v370_v63 = vpop.f32.mrf.mxu1 }
 0x16e   :  { %v447_v3 = vadd.f32 %v442_v45, %v369_v51  ;;  %v371_v4 = vadd.f32 %v370_v63, %v296_v44 }
 0x16f   :  { %v518_v6 = vpop.f32.mrf.mxu1  ;;  %v594_v7 = vpop.f32.mrf.mxu0 }
 0x170   :  { %v448_v10 = vadd.f32 %v444_v62, %v371_v4  ;;  %v523_v12 = vadd.f32 %v518_v6, %v447_v3 }
 0x171   :  { %v520_v13 = vpop.f32.mrf.mxu1  ;;  %v596_v17 = vpop.f32.mrf.mxu0 }
 0x172   :  { %v599_v2 = vadd.f32 %v594_v7, %v523_v12  ;;  %v524_v16 = vadd.f32 %v520_v13, %v448_v10 }
 0x174   :  { %601 = vst [vmem:[#allocation7] sm:$0xff] %v599_v2  ;;  %v600_v18 = vadd.f32 %v596_v17, %v524_v16 }
 0x176   :  { %602 = vst [vmem:[#allocation7 + $0x8] sm:$0xff] %v600_v18 }
 0x177   :  { %685 = shalt.err (!%p682_p0)
}
 0x178   :  { %612 = dma.vmem_to_hbm [thread:$0]  %s610_s11, 256, %s943_s7, [#allocation4]  }
 0x179   :  { %698 = dma.done.wait [#allocation4], 256  }
 0x17a   :  { %699 = vsyncadd [#allocation4], 4294967040 }
 0x17b   :  { %616 = vsyncpa [#allocation3], 1 }
 0x17c   :  { %617 = vsyncpa [#allocation6], 1 }
 0x17d   :  { %618 = vsyncpa [#allocation4], 1 }

</bundles_post_ra>
